<compile_context>
chip_gen: v7x
topology: tpu7x:2x2x1
jax: 0.10.0
libtpu: 0.0.40
codegen_flags: <defaults>
</compile_context>

<pallas_src>
import jax
import jax.numpy as jnp
from jax.experimental import pallas as pl
from jax.experimental.pallas import tpu as pltpu

_LANES = 128


def _min_sublanes(dtype):
    # Native TPU tiling: 32-bit -> (8,128), 16-bit -> (16,128).
    return 16 if jnp.dtype(dtype).itemsize == 2 else 8


def _make_bsm_kernel(dh):
    """Pointwise BSM kernel for hidden width `dh` on a lane-dense (tr,128) tile.

    params_ref (SMEM, f32[3*dh+1]): folded params [w1'_0.., b1'_0.., w2'_0.., b2'].
    x_ref / o_ref (VMEM, [tr, 128]): lane-dense batch tile.
    """

    def kernel(params_ref, x_ref, o_ref):
        # Hoist all SMEM scalar reads / splats above the unrolled loop
        # (JAX does not CSE scalar->vreg broadcasts).
        w1 = [params_ref[j] for j in range(dh)]
        b1 = [params_ref[dh + j] for j in range(dh)]
        w2 = [params_ref[2 * dh + j] for j in range(dh)]
        b2 = params_ref[3 * dh]

        x = x_ref[...].astype(jnp.float32)              # (tr, 128)
        acc = jnp.full_like(x, b2)                      # broadcast b2' once
        for j in range(dh):                             # static unroll (dh=4)
            acc = acc + w2[j] * jnp.tanh(w1[j] * x + b1[j])   # VPU muls/adds + EUP tanh
        o_ref[...] = acc.astype(o_ref.dtype)            # unmasked lane-dense store

    return kernel


def _pack_folded_params(w1, b1, w2, b2):
    # sigmoid(z) = 0.5*tanh(0.5*z) + 0.5, so
    #   out = b2 + sum_j w2_j * sigmoid(w1_j*x + b1_j)
    #       = (b2 + 0.5*sum(w2)) + sum_j (0.5*w2_j) * tanh((0.5*w1_j)*x + (0.5*b1_j))
    w1f = 0.5 * jnp.reshape(w1, (-1,)).astype(jnp.float32)
    b1f = 0.5 * jnp.reshape(b1, (-1,)).astype(jnp.float32)
    w2f = 0.5 * jnp.reshape(w2, (-1,)).astype(jnp.float32)
    b2f = jnp.reshape(b2, (-1,)).astype(jnp.float32) + jnp.sum(w2f)
    return jnp.concatenate([w1f, b1f, w2f, b2f])


def bsm_forward(x, w1, b1, w2, b2, *, block_rows=2048, io_dtype=jnp.float32,
                small_n_threshold=65536):
    """Pallas implementation of BSM([1, dh, 1]).forward.

    x : (N, 1) or (N,) float.  Returns (N,) in `io_dtype` (matches torch.squeeze
    of the (N, 1) output).  Call under the caller's jit so any residual
    pad/slice fuses with producer/consumer ops.
    """
    flat = jnp.reshape(x, (-1,))
    n = flat.shape[0]
    dh = w1.shape[-1]

    # Small-batch fast path: fused XLA elementwise graph beats the fixed
    # pallas_call launch + pad/reshape/slice overhead for tiny N.
    if n < small_n_threshold:
        z = flat.astype(jnp.float32)[:, None] * jnp.reshape(w1, (1, dh)) \
            + jnp.reshape(b1, (1, dh))
        out = jax.nn.sigmoid(z) @ jnp.reshape(w2, (dh, 1)) + jnp.reshape(b2, (1, 1))
        return jnp.reshape(out, (-1,)).astype(io_dtype)

    io_dtype = jnp.dtype(io_dtype)
    min_sub = _min_sublanes(io_dtype)
    params = _pack_folded_params(w1, b1, w2, b2)

    # Minimal padding: only to the next (min_sub x 128)-element boundary.
    rows = max(1, -(-n // _LANES))
    rows_aligned = -(-rows // min_sub) * min_sub
    pad = rows_aligned * _LANES - n

    flat_io = flat.astype(io_dtype)
    if pad:
        flat_io = jnp.pad(flat_io, (0, pad))
    x2d = flat_io.reshape(rows_aligned, _LANES)

    # Block sizing: large lane-dense tiles, but at least 2 grid steps so the
    # "parallel" batch axis can shard across v7x's two TensorCores.
    block_rows = max(min_sub, (block_rows // min_sub) * min_sub)
    if rows_aligned >= 2 * min_sub:
        half = -(-(rows_aligned // 2) // min_sub) * min_sub
        tr = min(block_rows, half)
    else:
        tr = min(block_rows, rows_aligned)
    grid = (pl.cdiv(rows_aligned, tr),)   # partial trailing block handled by Pallas

    out2d = pl.pallas_call(
        _make_bsm_kernel(dh),
        out_shape=jax.ShapeDtypeStruct((rows_aligned, _LANES), io_dtype),
        grid_spec=pltpu.PrefetchScalarGridSpec(
            num_scalar_prefetch=0,
            grid=grid,
            in_specs=[
                # All weights/biases live wholly in SMEM as scalars.
                pl.BlockSpec(memory_space=pltpu.MemorySpace.SMEM),
                # Lane-dense batch tile, tiled along grid axis 0.
                pl.BlockSpec((tr, _LANES), lambda i: (i, 0)),
            ],
            out_specs=pl.BlockSpec((tr, _LANES), lambda i: (i, 0)),
        ),
        compiler_params=pltpu.CompilerParams(
            dimension_semantics=("parallel",)),
    )(params, x2d)

    out = out2d.reshape(-1)
    if pad:
        out = out[:n]           # drop padding (padded lanes hold garbage values)
    return out


def init_bsm_params(key, architecture=(1, 4, 1)):
    """Deterministic init matching nn.Linear's U(-1/sqrt(fan_in), 1/sqrt(fan_in))."""
    din, dh, dout = architecture
    k1, k2, k3, k4 = jax.random.split(key, 4)
    bound1 = 1.0 / jnp.sqrt(din)
    bound2 = 1.0 / jnp.sqrt(dh)
    w1 = jax.random.uniform(k1, (din, dh), jnp.float32, -bound1, bound1)
    b1 = jax.random.uniform(k2, (1, dh), jnp.float32, -bound1, bound1)
    w2 = jax.random.uniform(k3, (dh, dout), jnp.float32, -bound2, bound2)
    b2 = jax.random.uniform(k4, (1, dout), jnp.float32, -bound2, bound2)
    return w1, b1, w2, b2


# TODO(synk): WeightClipping() is a training-time parameter mutation, not part
# of the forward pass; it is intentionally not implemented as a kernel.


if __name__ == "__main__":
    key = jax.random.PRNGKey(0)
    kx, kp = jax.random.split(key)
    w1, b1, w2, b2 = init_bsm_params(kp)

    def ref_forward(x):
        return jnp.squeeze(
            jax.nn.sigmoid(jnp.reshape(x, (-1, 1)) @ w1 + b1) @ w2 + b2, axis=-1)

    # Kernel path, jitted so pad/slice fuse with surrounding ops.  Force past
    # the small-N fast path so the pallas kernel is actually exercised.
    kernel_fwd = jax.jit(
        lambda xx: bsm_forward(xx, w1, b1, w2, b2, small_n_threshold=0))

    # 300: ragged tail + minimal pad; 4096: exactly aligned (no pad/slice);
    # 5000: >=2 grid steps with a partial trailing block.
    for n in (300, 4096, 5000):
        x = jax.random.normal(jax.random.fold_in(kx, n), (n, 1), jnp.float32)
        out = jax.block_until_ready(kernel_fwd(x))
        ref = ref_forward(x)
        assert out.shape == (n,), out.shape
        assert jnp.allclose(out, ref, atol=1e-4, rtol=1e-4), (
            n, float(jnp.max(jnp.abs(out - ref))))

    # Optional bf16-I/O streaming path (halves HBM traffic on v5e/v6e).
    x = jax.random.normal(kx, (5000, 1), jnp.float32)
    out_bf = jax.block_until_ready(
        bsm_forward(x, w1, b1, w2, b2, small_n_threshold=0,
                    io_dtype=jnp.bfloat16))
    assert out_bf.shape == (5000,)
    assert jnp.allclose(out_bf.astype(jnp.float32), ref_forward(x),
                        atol=3e-2, rtol=3e-2)

    # Default small-N fast path (no pallas_call) for tiny batches.
    x_small = jax.random.normal(kx, (300, 1), jnp.float32)
    out_small = jax.block_until_ready(bsm_forward(x_small, w1, b1, w2, b2))
    assert jnp.allclose(out_small, ref_forward(x_small), atol=1e-5, rtol=1e-5)

    print("KERNEL_OK")
</pallas_src>

<mosaic_0001>
module attributes {stable_mosaic.version = 11 : i64} {
  func.func @kernel(%arg0: i32, %arg1: memref<13xf32, #tpu.memory_space<smem>>, %arg2: memref<8x128xf32, #tpu.memory_space<vmem>>, %arg3: memref<8x128xf32, #tpu.memory_space<vmem>>) attributes {dimension_semantics = [#tpu.dimension_semantics<parallel>], iteration_bounds = array<i64: 1>, scalar_prefetch = 0 : i64, scratch_operands = 0 : i64, tpu.core_type = #tpu.core_type<tc>, window_params = [{transform_indices = @transform_0, window_bounds = array<i64: 13>}, {transform_indices = @transform_1, window_bounds = array<i64: 8, 128>}, {transform_indices = @transform_2, window_bounds = array<i64: 8, 128>}]} {
    %c0 = arith.constant 0 : index
    %0 = memref.load %arg1[%c0] : memref<13xf32, #tpu.memory_space<smem>>
    %c1 = arith.constant 1 : index
    %1 = memref.load %arg1[%c1] : memref<13xf32, #tpu.memory_space<smem>>
    %c2 = arith.constant 2 : index
    %2 = memref.load %arg1[%c2] : memref<13xf32, #tpu.memory_space<smem>>
    %c3 = arith.constant 3 : index
    %3 = memref.load %arg1[%c3] : memref<13xf32, #tpu.memory_space<smem>>
    %c4 = arith.constant 4 : index
    %4 = memref.load %arg1[%c4] : memref<13xf32, #tpu.memory_space<smem>>
    %c5 = arith.constant 5 : index
    %5 = memref.load %arg1[%c5] : memref<13xf32, #tpu.memory_space<smem>>
    %c6 = arith.constant 6 : index
    %6 = memref.load %arg1[%c6] : memref<13xf32, #tpu.memory_space<smem>>
    %c7 = arith.constant 7 : index
    %7 = memref.load %arg1[%c7] : memref<13xf32, #tpu.memory_space<smem>>
    %c8 = arith.constant 8 : index
    %8 = memref.load %arg1[%c8] : memref<13xf32, #tpu.memory_space<smem>>
    %c9 = arith.constant 9 : index
    %9 = memref.load %arg1[%c9] : memref<13xf32, #tpu.memory_space<smem>>
    %c10 = arith.constant 10 : index
    %10 = memref.load %arg1[%c10] : memref<13xf32, #tpu.memory_space<smem>>
    %c11 = arith.constant 11 : index
    %11 = memref.load %arg1[%c11] : memref<13xf32, #tpu.memory_space<smem>>
    %c12 = arith.constant 12 : index
    %12 = memref.load %arg1[%c12] : memref<13xf32, #tpu.memory_space<smem>>
    %c0_0 = arith.constant 0 : index
    %c0_1 = arith.constant 0 : index
    %13 = vector.load %arg2[%c0_0, %c0_1] : memref<8x128xf32, #tpu.memory_space<vmem>>, vector<8x128xf32>
    %14 = vector.broadcast %12 : f32 to vector<8x128xf32>
    %15 = vector.broadcast %0 : f32 to vector<8x128xf32>
    %16 = arith.mulf %15, %13 : vector<8x128xf32>
    %17 = vector.broadcast %4 : f32 to vector<8x128xf32>
    %18 = arith.addf %16, %17 : vector<8x128xf32>
    %19 = math.tanh %18 : vector<8x128xf32>
    %20 = vector.broadcast %8 : f32 to vector<8x128xf32>
    %21 = arith.mulf %20, %19 : vector<8x128xf32>
    %22 = arith.addf %14, %21 : vector<8x128xf32>
    %23 = vector.broadcast %1 : f32 to vector<8x128xf32>
    %24 = arith.mulf %23, %13 : vector<8x128xf32>
    %25 = vector.broadcast %5 : f32 to vector<8x128xf32>
    %26 = arith.addf %24, %25 : vector<8x128xf32>
    %27 = math.tanh %26 : vector<8x128xf32>
    %28 = vector.broadcast %9 : f32 to vector<8x128xf32>
    %29 = arith.mulf %28, %27 : vector<8x128xf32>
    %30 = arith.addf %22, %29 : vector<8x128xf32>
    %31 = vector.broadcast %2 : f32 to vector<8x128xf32>
    %32 = arith.mulf %31, %13 : vector<8x128xf32>
    %33 = vector.broadcast %6 : f32 to vector<8x128xf32>
    %34 = arith.addf %32, %33 : vector<8x128xf32>
    %35 = math.tanh %34 : vector<8x128xf32>
    %36 = vector.broadcast %10 : f32 to vector<8x128xf32>
    %37 = arith.mulf %36, %35 : vector<8x128xf32>
    %38 = arith.addf %30, %37 : vector<8x128xf32>
    %39 = vector.broadcast %3 : f32 to vector<8x128xf32>
    %40 = arith.mulf %39, %13 : vector<8x128xf32>
    %41 = vector.broadcast %7 : f32 to vector<8x128xf32>
    %42 = arith.addf %40, %41 : vector<8x128xf32>
    %43 = math.tanh %42 : vector<8x128xf32>
    %44 = vector.broadcast %11 : f32 to vector<8x128xf32>
    %45 = arith.mulf %44, %43 : vector<8x128xf32>
    %46 = arith.addf %38, %45 : vector<8x128xf32>
    %c0_2 = arith.constant 0 : index
    %c0_3 = arith.constant 0 : index
    %47 = vector.load %arg3[%c0_2, %c0_3] : memref<8x128xf32, #tpu.memory_space<vmem>>, vector<8x128xf32>
    tpu.vector_store %arg3[%c0_2, %c0_3], %46 {strides = array<i32>} : memref<8x128xf32, #tpu.memory_space<vmem>>, vector<8x128xf32>,
    return
  }
  func.func @transform_0(%arg0: i32) -> i32 {
    %c0_i32 = arith.constant 0 : i32
    %c0_i32_0 = arith.constant 0 : i32
    return %c0_i32 : i32
  }
  func.func @transform_1(%arg0: i32) -> (i32, i32) {
    %c0_i32 = arith.constant 0 : i32
    %c0_i32_0 = arith.constant 0 : i32
    return %arg0, %c0_i32 : i32, i32
  }
  func.func @transform_2(%arg0: i32) -> (i32, i32) {
    %c0_i32 = arith.constant 0 : i32
    %c0_i32_0 = arith.constant 0 : i32
    return %arg0, %c0_i32 : i32, i32
  }
}

</mosaic_0001>

<bundles_post_ra>
// kernel: _lambda_.1
= control target key start
LH: loop header
LB: loop body
LE: loop exit
PB: predicated region body
PF: predicated region fallthrough
CT: control target
= control target key end

     0   :  { %7 = vsyncpa [#allocation3], 0  ;;  %s137_s0 = inlined_call_operand.vmem [shape: f32[13], index: 0, kind: input, shape index: {}]   ;;  %s138_s1 = inlined_call_operand.vmem [shape: f32[8,128], index: 1, kind: input, shape index: {}]   ;;  %s139_s2 = inlined_call_operand.vmem [shape: f32[8,128], index: 2, kind: output, shape index: {}]  }
   0x1   :  { %s14_s11 = sshll.u32 %s137_s0, 4  ;;  %s15_s11 = int_to_ptr.vmem [resolvable:$true] %s14_s11 }
   0x2   :  { %s98_s12 = scalar_lea.vmem %s15_s11, 16  ;;  %p103_p1 = scmp.lt.s32.totalorder %s15_s11, %s15_s11 }
   0x3   :  { %p99_p0 = scmp.ne.s32.totalorder %s15_s11, %s98_s12  ;;  %p104_p2 = scmp.lt.s32.totalorder %s98_s12, %s98_s12 }
   0x5   :  { %p105_p3 = por %p104_p2, %p103_p1 }
   0x7   :  { %p106_p4 = pnand %p105_p3, %p99_p0 }
   0x9   :  { %109 = shalt.err (!%p106_p4)
}
   0xa   :  { %s112_s13 = smov [#allocation2]  }
   0xb   :  { %17 = dma.vmem_to_smem %s15_s11, 16, %s112_s13, [#allocation3]  }
   0xc   :  { %110 = dma.done.wait [#allocation3], 16  }
   0xd   :  { %111 = vsyncadd [#allocation3], 4294967280 }
   0xe   :  { %23 = sfence }
   0xf   :  { %s24_s14 = sld [smem:[#allocation2]]  ;;  %s77_s15 = sld [smem:[#allocation2 + $0x1]]  ;;  %v37_v0 = vld [vmem:[%s138_s1] sm:$0xff] }
  0x10   :  { %s78_s16 = sld [smem:[#allocation2 + $0x2]]  ;;  %s79_s17 = sld [smem:[#allocation2 + $0x3]] }
  0x11   :  { %s80_s18 = sld [smem:[#allocation2 + $0x4]]  ;;  %s81_s19 = sld [smem:[#allocation2 + $0x5]] }
  0x12   :  { %s82_s0 = sld [smem:[#allocation2 + $0x6]]  ;;  %s83_s20 = sld [smem:[#allocation2 + $0x7]] }
  0x13   :  { %s84_s23 = sld [smem:[#allocation2 + $0x8]]  ;;  %s85_s24 = sld [smem:[#allocation2 + $0x9]] }
  0x14   :  { %s86_s1 = sld [smem:[#allocation2 + $0xa]]  ;;  %s88_s25 = sld [smem:[#allocation2 + $0xc]] }
  0x15   :  { %v39_v1 = vstv %s24_s14  ;;  %v47_v2 = vstv %s77_s15  ;;  %s87_s26 = sld [smem:[#allocation2 + $0xb]] }
  0x16   :  { %v40_v3 = vmul.f32 %v39_v1, %v37_v0  ;;  %v48_v4 = vmul.f32 %v47_v2, %v37_v0  ;;  %v55_v5 = vstv %s78_s16  ;;  %v63_v6 = vstv %s79_s17 }
  0x17   :  { %v41_v7 = vstv %s80_s18  ;;  %v49_v8 = vstv %s81_s19  ;;  %v56_v9 = vmul.f32 %v55_v5, %v37_v0  ;;  %v64_v10 = vmul.f32 %v63_v6, %v37_v0 }
  0x18   :  { %v42_v11 = vadd.f32 %v41_v7, %v40_v3  ;;  %v50_v12 = vadd.f32 %v49_v8, %v48_v4  ;;  %v57_v13 = vstv %s82_s0  ;;  %v65_v14 = vstv %s83_s20 }
  0x19   :  { %v58_v15 = vadd.f32 %v57_v13, %v56_v9  ;;  %v66_v16 = vadd.f32 %v65_v14, %v64_v10  ;;  %v44_v17 = vstv %s84_s23  ;;  %v52_v18 = vstv %s85_s24 }
  0x1a   :  { %90 = vtanh.f32 %v42_v11  ;;  %v38_v20 = vstv %s88_s25  ;;  %v60_v21 = vstv %s86_s1 }
  0x1b   :  { %92 = vtanh.f32 %v50_v12  ;;  %v68_v26 = vstv %s87_s26 }
  0x1c   :  { %94 = vtanh.f32 %v58_v15 }
  0x1d   :  { %96 = vtanh.f32 %v66_v16 }
  0x24   :  { %v91_v19 = vpop.eup %90 }
  0x25   :  { %v93_v22 = vpop.eup %92  ;;  %v45_v23 = vmul.f32 %v91_v19, %v44_v17 }
  0x26   :  { %v95_v24 = vpop.eup %94  ;;  %v53_v25 = vmul.f32 %v93_v22, %v52_v18 }
  0x27   :  { %v97_v27 = vpop.eup %96  ;;  %v46_v28 = vadd.f32 %v45_v23, %v38_v20  ;;  %v61_v29 = vmul.f32 %v95_v24, %v60_v21 }
  0x28   :  { %v69_v31 = vmul.f32 %v97_v27, %v68_v26 }
  0x29   :  { %v54_v30 = vadd.f32 %v53_v25, %v46_v28 }
  0x2b   :  { %v62_v32 = vadd.f32 %v61_v29, %v54_v30 }
  0x2d   :  { %v70_v33 = vadd.f32 %v69_v31, %v62_v32 }
  0x2f   :  { %71 = vst [vmem:[%s139_s2] sm:$0xff] %v70_v33 }
  0x30   :  { %76 = vsyncpa [#allocation3], 1 }

</bundles_post_ra>
